<compile_context>
chip_gen: v6e
topology: v6e:2x2x1
jax: 0.10.0
libtpu: 0.0.40
codegen_flags: <defaults>
</compile_context>

<pallas_src>
import jax
import jax.numpy as jnp
from jax.experimental import pallas as pl
from jax.experimental.pallas import tpu as pltpu


def _make_kernel(n_layers, seq_len, hidden_dim):
    """Build the Pallas kernel body for a fixed (static) number of RNN layers."""
    has_rest = n_layers > 1

    def kernel(*refs):
        if has_rest:
            (x_ref, wih0_ref, wih_rest_ref, whh_ref, bih_ref, bhh_ref,
             wfc_ref, bfc_ref, out_ref, xp) = refs
        else:
            (x_ref, wih0_ref, whh_ref, bih_ref, bhh_ref,
             wfc_ref, bfc_ref, out_ref, xp) = refs
            wih_rest_ref = None

        S, H = seq_len, hidden_dim
        bf16 = jnp.bfloat16
        # Row-id grid for the off-critical-chain scatter of h into `seq`.
        row_ids = jax.lax.broadcasted_iota(jnp.int32, (S, H), 0)

        def run_layer(layer_idx):
            # Serial tanh recurrence over time for one layer.
            #  - `h` lives in vregs for the whole loop (no VMEM round trip on
            #    the serial dependency chain).
            #  - static Python loop over S == fully unrolled, static indices.
            #  - recurrent matmul in bf16 (f32 accumulation) => single MXU pass.
            #  - the write of h into `seq` is a VPU select on a vreg value
            #    (off the critical chain, consumes no store slots).
            whh_l = whh_ref[layer_idx]                    # (H, H) bf16, static idx
            h = jnp.zeros((1, H), jnp.float32)
            seq = jnp.zeros((S, H), jnp.float32)
            for t in range(S):                            # static -> unrolled
                pre = xp[pl.ds(t, 1), :] + jnp.dot(
                    h.astype(bf16), whh_l,
                    preferred_element_type=jnp.float32)
                h = jnp.tanh(pre)
                seq = jnp.where(row_ids == t, h, seq)
            return seq

        # Layer 0: project the whole input sequence in one bf16 MXU matmul
        # (f32 accumulation) and fold in both biases so per-step work in the
        # recurrence is minimal.
        xp[...] = (jnp.dot(x_ref[...].astype(bf16), wih0_ref[...],
                           preferred_element_type=jnp.float32)
                   + bih_ref[pl.ds(0, 1), :] + bhh_ref[pl.ds(0, 1), :])
        seq = run_layer(0)

        # Layers 1 .. n_layers-1 (static Python unroll over layers).
        for l in range(1, n_layers):
            xp[...] = (jnp.dot(seq.astype(bf16), wih_rest_ref[l - 1],
                               preferred_element_type=jnp.float32)
                       + bih_ref[pl.ds(l, 1), :] + bhh_ref[pl.ds(l, 1), :])
            seq = run_layer(l)

        # Final Linear + Sigmoid on the last layer's full output sequence
        # (kept in f32: single tiny matmul, output accuracy matters most here).
        logits = (jnp.dot(seq, wfc_ref[...],
                          preferred_element_type=jnp.float32)
                  + bfc_ref[...])
        out_ref[...] = jax.nn.sigmoid(logits)

    return kernel


def rnn_forward(x, params, n_layers):
    """Pallas wrapper. x: (seq_len, input_size) float32 -> (seq_len, 1) float32."""
    S, input_size = x.shape
    H = params["whh_t"].shape[-1]
    out_size = params["wfc_t"].shape[-1]
    bf16 = jnp.bfloat16

    # Everything that feeds the MXU ships bf16 (single-pass matmuls); biases,
    # the fc head and the output stay f32.
    in_arrays = [x, params["wih0_t"].astype(bf16)]
    if n_layers > 1:
        in_arrays.append(params["wih_rest_t"][: n_layers - 1].astype(bf16))
    in_arrays += [params["whh_t"].astype(bf16), params["bih"], params["bhh"],
                  params["wfc_t"], params["bfc"]]

    vmem_spec = pl.BlockSpec(memory_space=pltpu.MemorySpace.VMEM)
    return pl.pallas_call(
        _make_kernel(n_layers, S, H),
        out_shape=jax.ShapeDtypeStruct((S, out_size), jnp.float32),
        in_specs=[vmem_spec] * len(in_arrays),
        out_specs=vmem_spec,
        scratch_shapes=[
            pltpu.VMEM((S, H), jnp.float32),   # xp: input projection + biases
        ],
    )(*in_arrays)


def init_params(key, input_size, hidden_dim, n_layers, output_size):
    """Deterministic init mirroring PyTorch RNN/Linear shapes (uniform ±1/sqrt(H))."""
    k = 1.0 / float(hidden_dim) ** 0.5
    keys = jax.random.split(key, 7)
    Lr = max(n_layers - 1, 1)
    wih0 = jax.random.uniform(keys[0], (hidden_dim, input_size), minval=-k, maxval=k)
    wih_rest = jax.random.uniform(keys[1], (Lr, hidden_dim, hidden_dim), minval=-k, maxval=k)
    whh = jax.random.uniform(keys[2], (n_layers, hidden_dim, hidden_dim), minval=-k, maxval=k)
    bih = jax.random.uniform(keys[3], (n_layers, hidden_dim), minval=-k, maxval=k)
    bhh = jax.random.uniform(keys[4], (n_layers, hidden_dim), minval=-k, maxval=k)
    wfc = jax.random.uniform(keys[5], (output_size, hidden_dim), minval=-k, maxval=k)
    bfc = jax.random.uniform(keys[6], (output_size,), minval=-k, maxval=k)
    f32 = jnp.float32
    return {
        "wih0_t": wih0.T.astype(f32),                                  # (IN, H)
        "wih_rest_t": jnp.transpose(wih_rest, (0, 2, 1)).astype(f32),  # (Lr, H, H)
        "whh_t": jnp.transpose(whh, (0, 2, 1)).astype(f32),            # (L, H, H)
        "bih": bih.astype(f32),                                        # (L, H)
        "bhh": bhh.astype(f32),                                        # (L, H)
        "wfc_t": wfc.T.astype(f32),                                    # (H, 1)
        "bfc": bfc.reshape(1, output_size).astype(f32),                # (1, 1)
    }


def ref_forward(x, params, n_layers):
    """Pure-JAX f32 reference matching torch.nn.RNN(tanh) + Linear + Sigmoid."""
    S = x.shape[0]
    H = params["whh_t"].shape[-1]
    seq = x
    for l in range(n_layers):
        wih_t = params["wih0_t"] if l == 0 else params["wih_rest_t"][l - 1]
        xp = seq @ wih_t + params["bih"][l] + params["bhh"][l]
        h = jnp.zeros((H,), jnp.float32)
        outs = []
        for t in range(S):
            h = jnp.tanh(xp[t] + h @ params["whh_t"][l])
            outs.append(h)
        seq = jnp.stack(outs)
    logits = seq @ params["wfc_t"] + params["bfc"]
    return jax.nn.sigmoid(logits)


if __name__ == "__main__":
    # Small shapes consistent with the module: batch(=seq)=8, input=16,
    # hidden=32, 2 layers, output_size must be 1 for .view((batch, 1)).
    input_size, hidden_dim, n_layers, output_size = 16, 32, 2, 1
    batch = 8

    key = jax.random.PRNGKey(0)
    kx, kp = jax.random.split(key)
    x = jax.random.normal(kx, (batch, input_size), dtype=jnp.float32)
    params = init_params(kp, input_size, hidden_dim, n_layers, output_size)

    out = rnn_forward(x, params, n_layers)
    out = jax.block_until_ready(out)

    ref = ref_forward(x, params, n_layers)
    assert out.shape == (batch, 1), out.shape
    # Tolerance accounts for bf16 (f32-accum) on both the recurrent matmul and
    # the input/inter-layer projections; at S=8 the compounded error is well
    # inside 3e-2.  Re-validate (or keep the recurrence f32) at larger S.
    assert jnp.allclose(out, ref, atol=3e-2, rtol=3e-2), (
        "mismatch", float(jnp.max(jnp.abs(out - ref))))
    print("KERNEL_OK")
</pallas_src>

<mosaic_0001>
module attributes {stable_mosaic.version = 11 : i64} {
  func.func @kernel(%arg0: memref<8x16xf32, #tpu.memory_space<vmem>>, %arg1: memref<16x32xbf16, #tpu.memory_space<vmem>>, %arg2: memref<1x32x32xbf16, #tpu.memory_space<vmem>>, %arg3: memref<2x32x32xbf16, #tpu.memory_space<vmem>>, %arg4: memref<2x32xf32, #tpu.memory_space<vmem>>, %arg5: memref<2x32xf32, #tpu.memory_space<vmem>>, %arg6: memref<32x1xf32, #tpu.memory_space<vmem>>, %arg7: memref<1x1xf32, #tpu.memory_space<vmem>>, %arg8: memref<8x1xf32, #tpu.memory_space<vmem>>, %arg9: memref<8x32xf32, #tpu.memory_space<vmem>>) attributes {dimension_semantics = [], scalar_prefetch = 0 : i64, scratch_operands = 1 : i64, tpu.core_type = #tpu.core_type<tc>} {
    %0 = tpu.iota {dimensions = array<i32: 0>} : vector<8x32xi32>
    %c0 = arith.constant 0 : index
    %c0_0 = arith.constant 0 : index
    %1 = vector.load %arg0[%c0, %c0_0] : memref<8x16xf32, #tpu.memory_space<vmem>>, vector<8x16xf32>
    %2 = arith.truncf %1 : vector<8x16xf32> to vector<8x16xbf16>
    %c0_1 = arith.constant 0 : index
    %c0_2 = arith.constant 0 : index
    %3 = vector.load %arg1[%c0_1, %c0_2] : memref<16x32xbf16, #tpu.memory_space<vmem>>, vector<16x32xbf16>
    %cst = arith.constant dense<0.000000e+00> : vector<8x32xf32>
    %4 = tpu.matmul %2, %3, %cst {dimension_numbers = #tpu.dot_dimension_numbers<[1], [0], [0], [1], [0, 0, 1, 1], [], []>} : vector<8x16xbf16>, vector<16x32xbf16>, vector<8x32xf32> -> vector<8x32xf32>
    %c0_3 = arith.constant 0 : index
    %c0_4 = arith.constant 0 : index
    %5 = vector.load %arg4[%c0_3, %c0_4] : memref<2x32xf32, #tpu.memory_space<vmem>>, vector<1x32xf32>
    %6 = vector.broadcast %5 : vector<1x32xf32> to vector<8x32xf32>
    %7 = arith.addf %4, %6 : vector<8x32xf32>
    %c0_5 = arith.constant 0 : index
    %c0_6 = arith.constant 0 : index
    %8 = vector.load %arg5[%c0_5, %c0_6] : memref<2x32xf32, #tpu.memory_space<vmem>>, vector<1x32xf32>
    %9 = vector.broadcast %8 : vector<1x32xf32> to vector<8x32xf32>
    %10 = arith.addf %7, %9 : vector<8x32xf32>
    %c0_7 = arith.constant 0 : index
    %c0_8 = arith.constant 0 : index
    %11 = vector.load %arg9[%c0_7, %c0_8] : memref<8x32xf32, #tpu.memory_space<vmem>>, vector<8x32xf32>
    tpu.vector_store %arg9[%c0_7, %c0_8], %10 {strides = array<i32>} : memref<8x32xf32, #tpu.memory_space<vmem>>, vector<8x32xf32>,
    %c0_9 = arith.constant 0 : index
    %c0_10 = arith.constant 0 : index
    %c0_11 = arith.constant 0 : index
    %12 = vector.load %arg3[%c0_9, %c0_10, %c0_11] : memref<2x32x32xbf16, #tpu.memory_space<vmem>>, vector<1x32x32xbf16>
    %13 = vector.shape_cast %12 : vector<1x32x32xbf16> to vector<32x32xbf16>
    %cst_12 = arith.constant 0.000000e+00 : f32
    %14 = vector.broadcast %cst_12 : f32 to vector<1x32xf32>
    %cst_13 = arith.constant 0.000000e+00 : f32
    %15 = vector.broadcast %cst_13 : f32 to vector<8x32xf32>
    %c0_14 = arith.constant 0 : index
    %c0_15 = arith.constant 0 : index
    %16 = vector.load %arg9[%c0_14, %c0_15] : memref<8x32xf32, #tpu.memory_space<vmem>>, vector<1x32xf32>
    %17 = arith.truncf %14 : vector<1x32xf32> to vector<1x32xbf16>
    %cst_16 = arith.constant dense<0.000000e+00> : vector<1x32xf32>
    %18 = tpu.matmul %17, %13, %cst_16 {dimension_numbers = #tpu.dot_dimension_numbers<[1], [0], [0], [1], [0, 0, 1, 1], [], []>} : vector<1x32xbf16>, vector<32x32xbf16>, vector<1x32xf32> -> vector<1x32xf32>
    %19 = arith.addf %16, %18 : vector<1x32xf32>
    %20 = math.tanh %19 : vector<1x32xf32>
    %c0_i32 = arith.constant 0 : i32
    %21 = vector.broadcast %c0_i32 : i32 to vector<8x32xi32>
    %22 = arith.cmpi eq, %0, %21 : vector<8x32xi32>
    %23 = vector.shape_cast %20 : vector<1x32xf32> to vector<1x32xf32>
    %24 = vector.broadcast %23 : vector<1x32xf32> to vector<8x32xf32>
    %25 = arith.select %22, %24, %15 : vector<8x32xi1>, vector<8x32xf32>
    %c1 = arith.constant 1 : index
    %c0_17 = arith.constant 0 : index
    %26 = vector.load %arg9[%c1, %c0_17] : memref<8x32xf32, #tpu.memory_space<vmem>>, vector<1x32xf32>
    %27 = arith.truncf %20 : vector<1x32xf32> to vector<1x32xbf16>
    %cst_18 = arith.constant dense<0.000000e+00> : vector<1x32xf32>
    %28 = tpu.matmul %27, %13, %cst_18 {dimension_numbers = #tpu.dot_dimension_numbers<[1], [0], [0], [1], [0, 0, 1, 1], [], []>} : vector<1x32xbf16>, vector<32x32xbf16>, vector<1x32xf32> -> vector<1x32xf32>
    %29 = arith.addf %26, %28 : vector<1x32xf32>
    %30 = math.tanh %29 : vector<1x32xf32>
    %c1_i32 = arith.constant 1 : i32
    %31 = vector.broadcast %c1_i32 : i32 to vector<8x32xi32>
    %32 = arith.cmpi eq, %0, %31 : vector<8x32xi32>
    %33 = vector.shape_cast %30 : vector<1x32xf32> to vector<1x32xf32>
    %34 = vector.broadcast %33 : vector<1x32xf32> to vector<8x32xf32>
    %35 = arith.select %32, %34, %25 : vector<8x32xi1>, vector<8x32xf32>
    %c2 = arith.constant 2 : index
    %c0_19 = arith.constant 0 : index
    %36 = vector.load %arg9[%c2, %c0_19] : memref<8x32xf32, #tpu.memory_space<vmem>>, vector<1x32xf32>
    %37 = arith.truncf %30 : vector<1x32xf32> to vector<1x32xbf16>
    %cst_20 = arith.constant dense<0.000000e+00> : vector<1x32xf32>
    %38 = tpu.matmul %37, %13, %cst_20 {dimension_numbers = #tpu.dot_dimension_numbers<[1], [0], [0], [1], [0, 0, 1, 1], [], []>} : vector<1x32xbf16>, vector<32x32xbf16>, vector<1x32xf32> -> vector<1x32xf32>
    %39 = arith.addf %36, %38 : vector<1x32xf32>
    %40 = math.tanh %39 : vector<1x32xf32>
    %c2_i32 = arith.constant 2 : i32
    %41 = vector.broadcast %c2_i32 : i32 to vector<8x32xi32>
    %42 = arith.cmpi eq, %0, %41 : vector<8x32xi32>
    %43 = vector.shape_cast %40 : vector<1x32xf32> to vector<1x32xf32>
    %44 = vector.broadcast %43 : vector<1x32xf32> to vector<8x32xf32>
    %45 = arith.select %42, %44, %35 : vector<8x32xi1>, vector<8x32xf32>
    %c3 = arith.constant 3 : index
    %c0_21 = arith.constant 0 : index
    %46 = vector.load %arg9[%c3, %c0_21] : memref<8x32xf32, #tpu.memory_space<vmem>>, vector<1x32xf32>
    %47 = arith.truncf %40 : vector<1x32xf32> to vector<1x32xbf16>
    %cst_22 = arith.constant dense<0.000000e+00> : vector<1x32xf32>
    %48 = tpu.matmul %47, %13, %cst_22 {dimension_numbers = #tpu.dot_dimension_numbers<[1], [0], [0], [1], [0, 0, 1, 1], [], []>} : vector<1x32xbf16>, vector<32x32xbf16>, vector<1x32xf32> -> vector<1x32xf32>
    %49 = arith.addf %46, %48 : vector<1x32xf32>
    %50 = math.tanh %49 : vector<1x32xf32>
    %c3_i32 = arith.constant 3 : i32
    %51 = vector.broadcast %c3_i32 : i32 to vector<8x32xi32>
    %52 = arith.cmpi eq, %0, %51 : vector<8x32xi32>
    %53 = vector.shape_cast %50 : vector<1x32xf32> to vector<1x32xf32>
    %54 = vector.broadcast %53 : vector<1x32xf32> to vector<8x32xf32>
    %55 = arith.select %52, %54, %45 : vector<8x32xi1>, vector<8x32xf32>
    %c4 = arith.constant 4 : index
    %c0_23 = arith.constant 0 : index
    %56 = vector.load %arg9[%c4, %c0_23] : memref<8x32xf32, #tpu.memory_space<vmem>>, vector<1x32xf32>
    %57 = arith.truncf %50 : vector<1x32xf32> to vector<1x32xbf16>
    %cst_24 = arith.constant dense<0.000000e+00> : vector<1x32xf32>
    %58 = tpu.matmul %57, %13, %cst_24 {dimension_numbers = #tpu.dot_dimension_numbers<[1], [0], [0], [1], [0, 0, 1, 1], [], []>} : vector<1x32xbf16>, vector<32x32xbf16>, vector<1x32xf32> -> vector<1x32xf32>
    %59 = arith.addf %56, %58 : vector<1x32xf32>
    %60 = math.tanh %59 : vector<1x32xf32>
    %c4_i32 = arith.constant 4 : i32
    %61 = vector.broadcast %c4_i32 : i32 to vector<8x32xi32>
    %62 = arith.cmpi eq, %0, %61 : vector<8x32xi32>
    %63 = vector.shape_cast %60 : vector<1x32xf32> to vector<1x32xf32>
    %64 = vector.broadcast %63 : vector<1x32xf32> to vector<8x32xf32>
    %65 = arith.select %62, %64, %55 : vector<8x32xi1>, vector<8x32xf32>
    %c5 = arith.constant 5 : index
    %c0_25 = arith.constant 0 : index
    %66 = vector.load %arg9[%c5, %c0_25] : memref<8x32xf32, #tpu.memory_space<vmem>>, vector<1x32xf32>
    %67 = arith.truncf %60 : vector<1x32xf32> to vector<1x32xbf16>
    %cst_26 = arith.constant dense<0.000000e+00> : vector<1x32xf32>
    %68 = tpu.matmul %67, %13, %cst_26 {dimension_numbers = #tpu.dot_dimension_numbers<[1], [0], [0], [1], [0, 0, 1, 1], [], []>} : vector<1x32xbf16>, vector<32x32xbf16>, vector<1x32xf32> -> vector<1x32xf32>
    %69 = arith.addf %66, %68 : vector<1x32xf32>
    %70 = math.tanh %69 : vector<1x32xf32>
    %c5_i32 = arith.constant 5 : i32
    %71 = vector.broadcast %c5_i32 : i32 to vector<8x32xi32>
    %72 = arith.cmpi eq, %0, %71 : vector<8x32xi32>
    %73 = vector.shape_cast %70 : vector<1x32xf32> to vector<1x32xf32>
    %74 = vector.broadcast %73 : vector<1x32xf32> to vector<8x32xf32>
    %75 = arith.select %72, %74, %65 : vector<8x32xi1>, vector<8x32xf32>
    %c6 = arith.constant 6 : index
    %c0_27 = arith.constant 0 : index
    %76 = vector.load %arg9[%c6, %c0_27] : memref<8x32xf32, #tpu.memory_space<vmem>>, vector<1x32xf32>
    %77 = arith.truncf %70 : vector<1x32xf32> to vector<1x32xbf16>
    %cst_28 = arith.constant dense<0.000000e+00> : vector<1x32xf32>
    %78 = tpu.matmul %77, %13, %cst_28 {dimension_numbers = #tpu.dot_dimension_numbers<[1], [0], [0], [1], [0, 0, 1, 1], [], []>} : vector<1x32xbf16>, vector<32x32xbf16>, vector<1x32xf32> -> vector<1x32xf32>
    %79 = arith.addf %76, %78 : vector<1x32xf32>
    %80 = math.tanh %79 : vector<1x32xf32>
    %c6_i32 = arith.constant 6 : i32
    %81 = vector.broadcast %c6_i32 : i32 to vector<8x32xi32>
    %82 = arith.cmpi eq, %0, %81 : vector<8x32xi32>
    %83 = vector.shape_cast %80 : vector<1x32xf32> to vector<1x32xf32>
    %84 = vector.broadcast %83 : vector<1x32xf32> to vector<8x32xf32>
    %85 = arith.select %82, %84, %75 : vector<8x32xi1>, vector<8x32xf32>
    %c7 = arith.constant 7 : index
    %c0_29 = arith.constant 0 : index
    %86 = vector.load %arg9[%c7, %c0_29] : memref<8x32xf32, #tpu.memory_space<vmem>>, vector<1x32xf32>
    %87 = arith.truncf %80 : vector<1x32xf32> to vector<1x32xbf16>
    %cst_30 = arith.constant dense<0.000000e+00> : vector<1x32xf32>
    %88 = tpu.matmul %87, %13, %cst_30 {dimension_numbers = #tpu.dot_dimension_numbers<[1], [0], [0], [1], [0, 0, 1, 1], [], []>} : vector<1x32xbf16>, vector<32x32xbf16>, vector<1x32xf32> -> vector<1x32xf32>
    %89 = arith.addf %86, %88 : vector<1x32xf32>
    %90 = math.tanh %89 : vector<1x32xf32>
    %c7_i32 = arith.constant 7 : i32
    %91 = vector.broadcast %c7_i32 : i32 to vector<8x32xi32>
    %92 = arith.cmpi eq, %0, %91 : vector<8x32xi32>
    %93 = vector.shape_cast %90 : vector<1x32xf32> to vector<1x32xf32>
    %94 = vector.broadcast %93 : vector<1x32xf32> to vector<8x32xf32>
    %95 = arith.select %92, %94, %85 : vector<8x32xi1>, vector<8x32xf32>
    %96 = arith.truncf %95 : vector<8x32xf32> to vector<8x32xbf16>
    %c0_31 = arith.constant 0 : index
    %c0_32 = arith.constant 0 : index
    %c0_33 = arith.constant 0 : index
    %97 = vector.load %arg2[%c0_31, %c0_32, %c0_33] : memref<1x32x32xbf16, #tpu.memory_space<vmem>>, vector<1x32x32xbf16>
    %98 = vector.shape_cast %97 : vector<1x32x32xbf16> to vector<32x32xbf16>
    %cst_34 = arith.constant dense<0.000000e+00> : vector<8x32xf32>
    %99 = tpu.matmul %96, %98, %cst_34 {dimension_numbers = #tpu.dot_dimension_numbers<[1], [0], [0], [1], [0, 0, 1, 1], [], []>} : vector<8x32xbf16>, vector<32x32xbf16>, vector<8x32xf32> -> vector<8x32xf32>
    %c1_35 = arith.constant 1 : index
    %c0_36 = arith.constant 0 : index
    %100 = vector.load %arg4[%c1_35, %c0_36] : memref<2x32xf32, #tpu.memory_space<vmem>>, vector<1x32xf32>
    %101 = vector.broadcast %100 : vector<1x32xf32> to vector<8x32xf32>
    %102 = arith.addf %99, %101 : vector<8x32xf32>
    %c1_37 = arith.constant 1 : index
    %c0_38 = arith.constant 0 : index
    %103 = vector.load %arg5[%c1_37, %c0_38] : memref<2x32xf32, #tpu.memory_space<vmem>>, vector<1x32xf32>
    %104 = vector.broadcast %103 : vector<1x32xf32> to vector<8x32xf32>
    %105 = arith.addf %102, %104 : vector<8x32xf32>
    %c0_39 = arith.constant 0 : index
    %c0_40 = arith.constant 0 : index
    %106 = vector.load %arg9[%c0_39, %c0_40] : memref<8x32xf32, #tpu.memory_space<vmem>>, vector<8x32xf32>
    tpu.vector_store %arg9[%c0_39, %c0_40], %105 {strides = array<i32>} : memref<8x32xf32, #tpu.memory_space<vmem>>, vector<8x32xf32>,
    %c1_41 = arith.constant 1 : index
    %c0_42 = arith.constant 0 : index
    %c0_43 = arith.constant 0 : index
    %107 = vector.load %arg3[%c1_41, %c0_42, %c0_43] : memref<2x32x32xbf16, #tpu.memory_space<vmem>>, vector<1x32x32xbf16>
    %108 = vector.shape_cast %107 : vector<1x32x32xbf16> to vector<32x32xbf16>
    %cst_44 = arith.constant 0.000000e+00 : f32
    %109 = vector.broadcast %cst_44 : f32 to vector<1x32xf32>
    %cst_45 = arith.constant 0.000000e+00 : f32
    %110 = vector.broadcast %cst_45 : f32 to vector<8x32xf32>
    %c0_46 = arith.constant 0 : index
    %c0_47 = arith.constant 0 : index
    %111 = vector.load %arg9[%c0_46, %c0_47] : memref<8x32xf32, #tpu.memory_space<vmem>>, vector<1x32xf32>
    %112 = arith.truncf %109 : vector<1x32xf32> to vector<1x32xbf16>
    %cst_48 = arith.constant dense<0.000000e+00> : vector<1x32xf32>
    %113 = tpu.matmul %112, %108, %cst_48 {dimension_numbers = #tpu.dot_dimension_numbers<[1], [0], [0], [1], [0, 0, 1, 1], [], []>} : vector<1x32xbf16>, vector<32x32xbf16>, vector<1x32xf32> -> vector<1x32xf32>
    %114 = arith.addf %111, %113 : vector<1x32xf32>
    %115 = math.tanh %114 : vector<1x32xf32>
    %c0_i32_49 = arith.constant 0 : i32
    %116 = vector.broadcast %c0_i32_49 : i32 to vector<8x32xi32>
    %117 = arith.cmpi eq, %0, %116 : vector<8x32xi32>
    %118 = vector.shape_cast %115 : vector<1x32xf32> to vector<1x32xf32>
    %119 = vector.broadcast %118 : vector<1x32xf32> to vector<8x32xf32>
    %120 = arith.select %117, %119, %110 : vector<8x32xi1>, vector<8x32xf32>
    %c1_50 = arith.constant 1 : index
    %c0_51 = arith.constant 0 : index
    %121 = vector.load %arg9[%c1_50, %c0_51] : memref<8x32xf32, #tpu.memory_space<vmem>>, vector<1x32xf32>
    %122 = arith.truncf %115 : vector<1x32xf32> to vector<1x32xbf16>
    %cst_52 = arith.constant dense<0.000000e+00> : vector<1x32xf32>
    %123 = tpu.matmul %122, %108, %cst_52 {dimension_numbers = #tpu.dot_dimension_numbers<[1], [0], [0], [1], [0, 0, 1, 1], [], []>} : vector<1x32xbf16>, vector<32x32xbf16>, vector<1x32xf32> -> vector<1x32xf32>
    %124 = arith.addf %121, %123 : vector<1x32xf32>
    %125 = math.tanh %124 : vector<1x32xf32>
    %c1_i32_53 = arith.constant 1 : i32
    %126 = vector.broadcast %c1_i32_53 : i32 to vector<8x32xi32>
    %127 = arith.cmpi eq, %0, %126 : vector<8x32xi32>
    %128 = vector.shape_cast %125 : vector<1x32xf32> to vector<1x32xf32>
    %129 = vector.broadcast %128 : vector<1x32xf32> to vector<8x32xf32>
    %130 = arith.select %127, %129, %120 : vector<8x32xi1>, vector<8x32xf32>
    %c2_54 = arith.constant 2 : index
    %c0_55 = arith.constant 0 : index
    %131 = vector.load %arg9[%c2_54, %c0_55] : memref<8x32xf32, #tpu.memory_space<vmem>>, vector<1x32xf32>
    %132 = arith.truncf %125 : vector<1x32xf32> to vector<1x32xbf16>
    %cst_56 = arith.constant dense<0.000000e+00> : vector<1x32xf32>
    %133 = tpu.matmul %132, %108, %cst_56 {dimension_numbers = #tpu.dot_dimension_numbers<[1], [0], [0], [1], [0, 0, 1, 1], [], []>} : vector<1x32xbf16>, vector<32x32xbf16>, vector<1x32xf32> -> vector<1x32xf32>
    %134 = arith.addf %131, %133 : vector<1x32xf32>
    %135 = math.tanh %134 : vector<1x32xf32>
    %c2_i32_57 = arith.constant 2 : i32
    %136 = vector.broadcast %c2_i32_57 : i32 to vector<8x32xi32>
    %137 = arith.cmpi eq, %0, %136 : vector<8x32xi32>
    %138 = vector.shape_cast %135 : vector<1x32xf32> to vector<1x32xf32>
    %139 = vector.broadcast %138 : vector<1x32xf32> to vector<8x32xf32>
    %140 = arith.select %137, %139, %130 : vector<8x32xi1>, vector<8x32xf32>
    %c3_58 = arith.constant 3 : index
    %c0_59 = arith.constant 0 : index
    %141 = vector.load %arg9[%c3_58, %c0_59] : memref<8x32xf32, #tpu.memory_space<vmem>>, vector<1x32xf32>
    %142 = arith.truncf %135 : vector<1x32xf32> to vector<1x32xbf16>
    %cst_60 = arith.constant dense<0.000000e+00> : vector<1x32xf32>
    %143 = tpu.matmul %142, %108, %cst_60 {dimension_numbers = #tpu.dot_dimension_numbers<[1], [0], [0], [1], [0, 0, 1, 1], [], []>} : vector<1x32xbf16>, vector<32x32xbf16>, vector<1x32xf32> -> vector<1x32xf32>
    %144 = arith.addf %141, %143 : vector<1x32xf32>
    %145 = math.tanh %144 : vector<1x32xf32>
    %c3_i32_61 = arith.constant 3 : i32
    %146 = vector.broadcast %c3_i32_61 : i32 to vector<8x32xi32>
    %147 = arith.cmpi eq, %0, %146 : vector<8x32xi32>
    %148 = vector.shape_cast %145 : vector<1x32xf32> to vector<1x32xf32>
    %149 = vector.broadcast %148 : vector<1x32xf32> to vector<8x32xf32>
    %150 = arith.select %147, %149, %140 : vector<8x32xi1>, vector<8x32xf32>
    %c4_62 = arith.constant 4 : index
    %c0_63 = arith.constant 0 : index
    %151 = vector.load %arg9[%c4_62, %c0_63] : memref<8x32xf32, #tpu.memory_space<vmem>>, vector<1x32xf32>
    %152 = arith.truncf %145 : vector<1x32xf32> to vector<1x32xbf16>
    %cst_64 = arith.constant dense<0.000000e+00> : vector<1x32xf32>
    %153 = tpu.matmul %152, %108, %cst_64 {dimension_numbers = #tpu.dot_dimension_numbers<[1], [0], [0], [1], [0, 0, 1, 1], [], []>} : vector<1x32xbf16>, vector<32x32xbf16>, vector<1x32xf32> -> vector<1x32xf32>
    %154 = arith.addf %151, %153 : vector<1x32xf32>
    %155 = math.tanh %154 : vector<1x32xf32>
    %c4_i32_65 = arith.constant 4 : i32
    %156 = vector.broadcast %c4_i32_65 : i32 to vector<8x32xi32>
    %157 = arith.cmpi eq, %0, %156 : vector<8x32xi32>
    %158 = vector.shape_cast %155 : vector<1x32xf32> to vector<1x32xf32>
    %159 = vector.broadcast %158 : vector<1x32xf32> to vector<8x32xf32>
    %160 = arith.select %157, %159, %150 : vector<8x32xi1>, vector<8x32xf32>
    %c5_66 = arith.constant 5 : index
    %c0_67 = arith.constant 0 : index
    %161 = vector.load %arg9[%c5_66, %c0_67] : memref<8x32xf32, #tpu.memory_space<vmem>>, vector<1x32xf32>
    %162 = arith.truncf %155 : vector<1x32xf32> to vector<1x32xbf16>
    %cst_68 = arith.constant dense<0.000000e+00> : vector<1x32xf32>
    %163 = tpu.matmul %162, %108, %cst_68 {dimension_numbers = #tpu.dot_dimension_numbers<[1], [0], [0], [1], [0, 0, 1, 1], [], []>} : vector<1x32xbf16>, vector<32x32xbf16>, vector<1x32xf32> -> vector<1x32xf32>
    %164 = arith.addf %161, %163 : vector<1x32xf32>
    %165 = math.tanh %164 : vector<1x32xf32>
    %c5_i32_69 = arith.constant 5 : i32
    %166 = vector.broadcast %c5_i32_69 : i32 to vector<8x32xi32>
    %167 = arith.cmpi eq, %0, %166 : vector<8x32xi32>
    %168 = vector.shape_cast %165 : vector<1x32xf32> to vector<1x32xf32>
    %169 = vector.broadcast %168 : vector<1x32xf32> to vector<8x32xf32>
    %170 = arith.select %167, %169, %160 : vector<8x32xi1>, vector<8x32xf32>
    %c6_70 = arith.constant 6 : index
    %c0_71 = arith.constant 0 : index
    %171 = vector.load %arg9[%c6_70, %c0_71] : memref<8x32xf32, #tpu.memory_space<vmem>>, vector<1x32xf32>
    %172 = arith.truncf %165 : vector<1x32xf32> to vector<1x32xbf16>
    %cst_72 = arith.constant dense<0.000000e+00> : vector<1x32xf32>
    %173 = tpu.matmul %172, %108, %cst_72 {dimension_numbers = #tpu.dot_dimension_numbers<[1], [0], [0], [1], [0, 0, 1, 1], [], []>} : vector<1x32xbf16>, vector<32x32xbf16>, vector<1x32xf32> -> vector<1x32xf32>
    %174 = arith.addf %171, %173 : vector<1x32xf32>
    %175 = math.tanh %174 : vector<1x32xf32>
    %c6_i32_73 = arith.constant 6 : i32
    %176 = vector.broadcast %c6_i32_73 : i32 to vector<8x32xi32>
    %177 = arith.cmpi eq, %0, %176 : vector<8x32xi32>
    %178 = vector.shape_cast %175 : vector<1x32xf32> to vector<1x32xf32>
    %179 = vector.broadcast %178 : vector<1x32xf32> to vector<8x32xf32>
    %180 = arith.select %177, %179, %170 : vector<8x32xi1>, vector<8x32xf32>
    %c7_74 = arith.constant 7 : index
    %c0_75 = arith.constant 0 : index
    %181 = vector.load %arg9[%c7_74, %c0_75] : memref<8x32xf32, #tpu.memory_space<vmem>>, vector<1x32xf32>
    %182 = arith.truncf %175 : vector<1x32xf32> to vector<1x32xbf16>
    %cst_76 = arith.constant dense<0.000000e+00> : vector<1x32xf32>
    %183 = tpu.matmul %182, %108, %cst_76 {dimension_numbers = #tpu.dot_dimension_numbers<[1], [0], [0], [1], [0, 0, 1, 1], [], []>} : vector<1x32xbf16>, vector<32x32xbf16>, vector<1x32xf32> -> vector<1x32xf32>
    %184 = arith.addf %181, %183 : vector<1x32xf32>
    %185 = math.tanh %184 : vector<1x32xf32>
    %c7_i32_77 = arith.constant 7 : i32
    %186 = vector.broadcast %c7_i32_77 : i32 to vector<8x32xi32>
    %187 = arith.cmpi eq, %0, %186 : vector<8x32xi32>
    %188 = vector.shape_cast %185 : vector<1x32xf32> to vector<1x32xf32>
    %189 = vector.broadcast %188 : vector<1x32xf32> to vector<8x32xf32>
    %190 = arith.select %187, %189, %180 : vector<8x32xi1>, vector<8x32xf32>
    %c0_78 = arith.constant 0 : index
    %c0_79 = arith.constant 0 : index
    %191 = vector.load %arg6[%c0_78, %c0_79] : memref<32x1xf32, #tpu.memory_space<vmem>>, vector<32x1xf32>
    %cst_80 = arith.constant dense<0.000000e+00> : vector<8x1xf32>
    %192 = tpu.matmul %190, %191, %cst_80 {dimension_numbers = #tpu.dot_dimension_numbers<[1], [0], [0], [1], [0, 0, 1, 1], [], []>} : vector<8x32xf32>, vector<32x1xf32>, vector<8x1xf32> -> vector<8x1xf32>
    %c0_81 = arith.constant 0 : index
    %c0_82 = arith.constant 0 : index
    %193 = vector.load %arg7[%c0_81, %c0_82] : memref<1x1xf32, #tpu.memory_space<vmem>>, vector<1x1xf32>
    %194 = vector.broadcast %193 : vector<1x1xf32> to vector<8x1xf32>
    %195 = arith.addf %192, %194 : vector<8x1xf32>
    %196 = arith.negf %195 : vector<8x1xf32>
    %197 = math.exp %196 : vector<8x1xf32>
    %cst_83 = arith.constant 1.000000e+00 : f32
    %198 = vector.broadcast %cst_83 : f32 to vector<8x1xf32>
    %199 = arith.addf %198, %197 : vector<8x1xf32>
    %200 = arith.divf %198, %199 : vector<8x1xf32>
    %c0_84 = arith.constant 0 : index
    %c0_85 = arith.constant 0 : index
    %201 = vector.load %arg8[%c0_84, %c0_85] : memref<8x1xf32, #tpu.memory_space<vmem>>, vector<8x1xf32>
    tpu.vector_store %arg8[%c0_84, %c0_85], %200 {strides = array<i32>} : memref<8x1xf32, #tpu.memory_space<vmem>>, vector<8x1xf32>,
    return
  }
}

</mosaic_0001>

<bundles_post_ra>
// kernel: tpu_custom_call.1
= control target key start
LH: loop header
LB: loop body
LE: loop exit
PB: predicated region body
PF: predicated region fallthrough
CT: control target
= control target key end

     0   :  { %s1807_s0 = inlined_call_operand.vmem [shape: f32[8,16], index: 0, kind: input, shape index: {}]   ;;  %s1808_s1 = inlined_call_operand.hbm [shape: bf16[16,32], index: 1, kind: input, shape index: {}]   ;;  %s1809_s2 = inlined_call_operand.hbm [shape: bf16[1,32,32], index: 2, kind: input, shape index: {}]   ;;  %s1810_s3 = inlined_call_operand.vmem [shape: bf16[2,32,32], index: 3, kind: input, shape index: {}]   ;;  %s1811_s4 = inlined_call_operand.vmem [shape: f32[2,32], index: 4, kind: input, shape index: {}]   ;;  %s1812_s5 = inlined_call_operand.vmem [shape: f32[2,32], index: 5, kind: input, shape index: {}]   ;;  %s1813_s6 = inlined_call_operand.vmem [shape: f32[32,1], index: 6, kind: input, shape index: {}]   ;;  %s1814_s7 = inlined_call_operand.<no memory space> [shape: f32[1,1], index: 7, kind: input, shape index: {}]   ;;  %s1815_s8 = inlined_call_operand.vmem [shape: f32[8,1], index: 8, kind: output, shape index: {}]  }
   0x1   :  { %v13_v0 = vstv %s1814_s7 }
   0x2   :  { %14 = vst [vmem:[#allocation3] sm:$0x1] %v13_v0 }
   0x3   :  { %15 = vsyncpa [#allocation5], 0 }
   0x4   :  { %16 = vsyncpa [#allocation7], 0  ;;  %s1506_s29 = smov [#allocation4]  }
   0x5   :  { %s24_s30 = sshll.u32 %s1506_s29, 4  ;;  %s25_s30 = int_to_ptr.vmem [resolvable:$true] %s24_s30 }
   0x6   :  { %s1470_s9 = scalar_lea.vmem %s25_s30, 128  ;;  %p1475_p1 = scmp.lt.s32.totalorder %s25_s30, %s25_s30 }
   0x7   :  { %p1471_p0 = scmp.ne.s32.totalorder %s25_s30, %s1470_s9  ;;  %p1476_p2 = scmp.lt.s32.totalorder %s1470_s9, %s1470_s9 }
   0x9   :  { %p1477_p3 = por %p1476_p2, %p1475_p1 }
   0xb   :  { %p1478_p4 = pnand %p1477_p3, %p1471_p0 }
   0xd   :  { %1481 = shalt.err (!%p1478_p4)
}
   0xe   :  { %s1507_s10 = smov 64   ;;  %s1508_s11 = smov 4  }
   0xf   :  { %30 = dma.hbm_to_vmem [thread:$0]  %s1808_s1, 128, %s25_s30, [#allocation5], %s1507_s10, %s1507_s10, %s1508_s11  }
  0x10   :  { %s1509_s7 = smov [#allocation6]  }
  0x11   :  { %s36_s14 = sshll.u32 %s1509_s7, 4  ;;  %s37_s14 = int_to_ptr.vmem [resolvable:$true] %s36_s14 }
  0x12   :  { %s1490_s15 = scalar_lea.vmem %s37_s14, 256  ;;  %p1495_p6 = scmp.lt.s32.totalorder %s37_s14, %s37_s14 }
  0x13   :  { %p1491_p5 = scmp.ne.s32.totalorder %s37_s14, %s1490_s15  ;;  %p1496_p7 = scmp.lt.s32.totalorder %s1490_s15, %s1490_s15 }
  0x15   :  { %p1497_p8 = por %p1496_p7, %p1495_p6 }
  0x17   :  { %p1498_p9 = pnand %p1497_p8, %p1491_p5 }
  0x19   :  { %1501 = shalt.err (!%p1498_p9)
}
  0x1a   :  { %42 = dma.hbm_to_vmem [thread:$0]  %s1809_s2, 256, %s37_s14, [#allocation7], %s1507_s10, %s1507_s10, %s1508_s11  }
  0x1b   :  { %1502 = dma.done.wait [#allocation5], 128  }
  0x1c   :  { %1503 = vsyncadd [#allocation5], 4294967168 }
  0x1d   :  { %1504 = dma.done.wait [#allocation7], 256  }
  0x1e   :  { %1505 = vsyncadd [#allocation7], 4294967040  ;;  %v1510_v1 = vmov 0.0   ;;  %vm1511_vm0 = vmmov 0   ;;  %v1419_v2 = vld [vmem:[#allocation4] sm:$0xff]   ;;  %v62_v4 = vld [vmem:[%s1807_s0] sm:$0xff]  ;;  %v60_v27 = vlaneseq }
  0x1f   :  { %1259 = vmatprep.subr.bf16.mxu0 %v1510_v1  ;;  %1265 = vmatprep.subr.bf16.mxu1 %v1510_v1  ;;  %v1576_v3 = vld [vmem:[%s1810_s3 + $0x8] sm:$0xff]   ;;  %vm77_vm1 = vcmask 130048   ;;  %v63_v5 = vpack.c.bf16 %v62_v4, %v62_v4  ;;  %v1585_v6 = vld [vmem:[%s1810_s3] sm:$0xff]   ;;  %v1512_v7 = vmov 0   ;;  %vm127_vm2 = vcmask 261120  }
  0x20   :  { %1261 = vmatprep.mubr.msk.bf16.mxu0 %vm1511_vm0, %v1510_v1  ;;  %1269 = vmatprep.mubr.msk.bf16.mxu1 %vm1511_vm0, %v1510_v1  ;;  %v1167_v8 = vld [vmem:[%s1811_s4] ss:$0 sm:$0xff]  ;;  %v1618_v30 = vshrl.u32 %v60_v27, 7  ;;  %vm1159_vm11 = vcmask 7168  }
  0x21   :  { %1260 = vmatpush3.bf16.msra.mxu0 %v1419_v2  ;;  %1266 = vmatpush3.bf16.msra.mxu1 %v1576_v3  ;;  %v1170_v10 = vld [vmem:[%s1812_s5] ss:$0 sm:$0xff] }
  0x22   :  { %1273 = vmatprep.subr.bf16.mxu0 %v1510_v1  ;;  %1267 = vmatprep.subr.bf16.mxu1 %v1510_v1  ;;  %v1621_v32 = vsub.s32 0, %v1618_v30  ;;  %vm191_vm3 = vcmp.eq.s32.totalorder %v1618_v30, 0  ;;  %vm244_vm4 = vcmp.eq.s32.totalorder %v1618_v30, 1  ;;  %vm297_vm5 = vcmp.eq.s32.totalorder %v1618_v30, 2  ;;  %v1422_v27 = vld [vmem:[#allocation6 + $0x8] sm:$0xff]  }
  0x23   :  { %vm350_vm6 = vcmp.eq.s32.totalorder %v1618_v30, 3  ;;  %vm403_vm7 = vcmp.eq.s32.totalorder %v1618_v30, 4  ;;  %vm456_vm8 = vcmp.eq.s32.totalorder %v1618_v30, 5  ;;  %vm509_vm9 = vcmp.eq.s32.totalorder %v1618_v30, 6 }
  0x24   :  { %1262 = vmatmul.mubr.msk.bf16.vlgmr.msra.gmra.mxu0 %vm77_vm1, %v63_v5  ;;  %vm562_vm10 = vcmp.eq.s32.totalorder %v1618_v30, 7 }
  0x25   :  { %1274 = vmatpush3.bf16.msra.mxu0 %v1576_v3  ;;  %1277 = vmatprep.mubr.msk.bf16.mxu0 %vm1511_vm0, %v1510_v1 }
  0x26   :  { %1268 = vmatpush3.bf16.msra.mxu1 %v1585_v6  ;;  %1275 = vmatprep.subr.bf16.mxu0 %v1510_v1 }
  0x27   :  { %1281 = vmatprep.subr.bf16.mxu1 %v1510_v1 }
  0x29   :  { %1270 = vmatmul.mubr.bf16.vlgmr.msra.gmra.mxu1 %v1512_v7  ;;  %1276 = vmatpush3.bf16.msra.mxu0 %v1585_v6 }
  0x2a   :  { %1282 = vmatpush3.bf16.msra.mxu1 %v1576_v3  ;;  %1285 = vmatprep.mubr.msk.bf16.mxu1 %vm1511_vm0, %v1510_v1 }
  0x2b   :  { %1283 = vmatprep.subr.bf16.mxu1 %v1510_v1  ;;  %1289 = vmatprep.subr.bf16.mxu0 %v1510_v1 }
  0x2e   :  { %1284 = vmatpush3.bf16.msra.mxu1 %v1585_v6 }
  0x2f   :  { %1297 = vmatprep.subr.bf16.mxu1 %v1510_v1 }
  0xe4   :  { %v115_v9 = vpop.f32.mrf.mxu0 }
  0xe5   :  { %v116_v11 = vadd.f32 %v1167_v8, %v115_v9 }
  0xe6   :  { %v1263_v12 = vpop.f32.mrf.mxu0 }
  0xe7   :  { %v126_v13 = vadd.f32 %v1170_v10, %v116_v11 }
  0xe8   :  { %v118_v14 = vpop.f32.mrf.mxu0 }
  0xe9   :  { %128 = vst.msk [vmem:[#allocation2] sm:$0xff] %vm127_vm2, %v126_v13  ;;  %v183_v15 = vpop.f32.mrf.mxu1 }
  0xea   :  { %v1264_v16 = vpop.f32.mrf.mxu0 }
  0xeb   :  { %v1271_v17 = vpop.f32.mrf.mxu1 }
  0xed   :  { %v186_v18 = vpop.f32.mrf.mxu1 }
  0xef   :  { %v1272_v19 = vpop.f32.mrf.mxu1 }
  0xf0   :  { %v133_v20 = vld [vmem:[#allocation2] sm:$0x1]  ;;  %v197_v24 = vld [vmem:[#allocation2 + $0x1] sm:$0x1]  ;;  %v250_v39 = vld [vmem:[#allocation2 + $0x2] sm:$0x1] }
  0xf1   :  { %v189_v21 = vadd.f32 %v183_v15, %v133_v20  ;;  %v303_v49 = vld [vmem:[#allocation2 + $0x3] sm:$0x1]  ;;  %v356_v59 = vld [vmem:[#allocation2 + $0x4] sm:$0x1]  ;;  %v409_v9 = vld [vmem:[#allocation2 + $0x5] sm:$0x1] }
  0xf2   :  { %v462_v17 = vld [vmem:[#allocation2 + $0x6] sm:$0x1] }
  0xf3   :  { %1426 = vtanh.f32 %v189_v21 }
 0x100   :  { %v1427_v22 = vpop.eup %1426 }
 0x101   :  { %v198_v23 = vpack.c.bf16 %v1427_v22, %v1427_v22  ;;  %v195_v33 = vrot.slane %v1427_v22, %v1621_v32 }
 0x103   :  { %1278 = vmatmul.mubr.msk.bf16.vlgmr.msra.gmra.mxu0 %vm127_vm2, %v198_v23  ;;  %v196_v37 = vsel %vm191_vm3, %v195_v33, 0.0  ;;  %v515_v33 = vld [vmem:[#allocation2 + $0x7] sm:$0x1] }
 0x104   :  { %1290 = vmatpush3.bf16.msra.mxu0 %v1576_v3  ;;  %1293 = vmatprep.mubr.msk.bf16.mxu0 %vm1511_vm0, %v1510_v1 }
 0x105   :  { %1291 = vmatprep.subr.bf16.mxu0 %v1510_v1 }
 0x108   :  { %1292 = vmatpush3.bf16.msra.mxu0 %v1585_v6 }
 0x109   :  { %1305 = vmatprep.subr.bf16.mxu0 %v1510_v1 }
 0x1c3   :  { %v236_v25 = vpop.f32.mrf.mxu0 }
 0x1c4   :  { %v242_v26 = vadd.f32 %v236_v25, %v197_v24 }
 0x1c5   :  { %v1279_v28 = vpop.f32.mrf.mxu0 }
 0x1c6   :  { %1428 = vtanh.f32 %v242_v26  ;;  %v1423_v28 = vld [vmem:[#allocation6] sm:$0xff]  }
 0x1c7   :  { %v239_v29 = vpop.f32.mrf.mxu0 }
 0x1c8   :  { %v1688_v29 = vld [vmem:[%s1810_s3 + $0x18] sm:$0xff]  }
 0x1c9   :  { %v1280_v31 = vpop.f32.mrf.mxu0 }
 0x1ca   :  { %v1696_v31 = vld [vmem:[%s1810_s3 + $0x10] sm:$0xff]  }
 0x1d3   :  { %v1429_v34 = vpop.eup %1428 }
 0x1d4   :  { %v248_v35 = vrot.slane %v1429_v34, %v1621_v32  ;;  %v251_v36 = vpack.c.bf16 %v1429_v34, %v1429_v34 }
 0x1d6   :  { %v249_v38 = vsel %vm244_vm4, %v248_v35, %v196_v37  ;;  %1286 = vmatmul.mubr.msk.bf16.vlgmr.msra.gmra.mxu1 %vm127_vm2, %v251_v36 }
 0x1d7   :  { %1298 = vmatpush3.bf16.msra.mxu1 %v1576_v3  ;;  %1301 = vmatprep.mubr.msk.bf16.mxu1 %vm1511_vm0, %v1510_v1 }
 0x1d8   :  { %1299 = vmatprep.subr.bf16.mxu1 %v1510_v1 }
 0x1db   :  { %1300 = vmatpush3.bf16.msra.mxu1 %v1585_v6 }
 0x1dc   :  { %1313 = vmatprep.subr.bf16.mxu1 %v1510_v1 }
 0x296   :  { %v289_v40 = vpop.f32.mrf.mxu1 }
 0x297   :  { %v295_v41 = vadd.f32 %v289_v40, %v250_v39 }
 0x298   :  { %v1287_v42 = vpop.f32.mrf.mxu1 }
 0x299   :  { %1430 = vtanh.f32 %v295_v41 }
 0x29a   :  { %v292_v43 = vpop.f32.mrf.mxu1 }
 0x29c   :  { %v1288_v44 = vpop.f32.mrf.mxu1 }
 0x2a6   :  { %v1431_v45 = vpop.eup %1430 }
 0x2a7   :  { %v301_v46 = vrot.slane %v1431_v45, %v1621_v32  ;;  %v304_v47 = vpack.c.bf16 %v1431_v45, %v1431_v45 }
 0x2a9   :  { %v302_v48 = vsel %vm297_vm5, %v301_v46, %v249_v38  ;;  %1294 = vmatmul.mubr.msk.bf16.vlgmr.msra.gmra.mxu0 %vm127_vm2, %v304_v47  ;;  %v1180_v46 = vld [vmem:[%s1811_s4 + $0x1] ss:$0 sm:$0xff] }
 0x2aa   :  { %1306 = vmatpush3.bf16.msra.mxu0 %v1576_v3  ;;  %1309 = vmatprep.mubr.msk.bf16.mxu0 %vm1511_vm0, %v1510_v1 }
 0x2ab   :  { %1307 = vmatprep.subr.bf16.mxu0 %v1510_v1 }
 0x2ae   :  { %1308 = vmatpush3.bf16.msra.mxu0 %v1585_v6 }
 0x2af   :  { %1321 = vmatprep.subr.bf16.mxu0 %v1510_v1 }
 0x369   :  { %v342_v50 = vpop.f32.mrf.mxu0 }
 0x36a   :  { %v348_v51 = vadd.f32 %v342_v50, %v303_v49 }
 0x36b   :  { %v1295_v52 = vpop.f32.mrf.mxu0 }
 0x36c   :  { %1432 = vtanh.f32 %v348_v51 }
 0x36d   :  { %v345_v53 = vpop.f32.mrf.mxu0 }
 0x36f   :  { %v1296_v54 = vpop.f32.mrf.mxu0 }
 0x379   :  { %v1433_v55 = vpop.eup %1432 }
 0x37a   :  { %v354_v56 = vrot.slane %v1433_v55, %v1621_v32  ;;  %v357_v57 = vpack.c.bf16 %v1433_v55, %v1433_v55 }
 0x37c   :  { %v355_v58 = vsel %vm350_vm6, %v354_v56, %v302_v48  ;;  %1302 = vmatmul.mubr.msk.bf16.vlgmr.msra.gmra.mxu1 %vm127_vm2, %v357_v57  ;;  %v1184_v48 = vld [vmem:[%s1812_s5 + $0x1] ss:$0 sm:$0xff] }
 0x37d   :  { %1314 = vmatpush3.bf16.msra.mxu1 %v1576_v3  ;;  %1317 = vmatprep.mubr.msk.bf16.mxu1 %vm1511_vm0, %v1510_v1 }
 0x37e   :  { %1315 = vmatprep.subr.bf16.mxu1 %v1510_v1 }
 0x381   :  { %1316 = vmatpush3.bf16.msra.mxu1 %v1585_v6 }
 0x382   :  { %1329 = vmatprep.subr.bf16.mxu1 %v1510_v1 }
 0x43c   :  { %v395_v60 = vpop.f32.mrf.mxu1 }
 0x43d   :  { %v401_v61 = vadd.f32 %v395_v60, %v356_v59 }
 0x43e   :  { %v1303_v62 = vpop.f32.mrf.mxu1 }
 0x43f   :  { %1434 = vtanh.f32 %v401_v61 }
 0x440   :  { %v398_v63 = vpop.f32.mrf.mxu1 }
 0x442   :  { %v1304_v0 = vpop.f32.mrf.mxu1 }
 0x44c   :  { %v1435_v2 = vpop.eup %1434 }
 0x44d   :  { %v407_v4 = vrot.slane %v1435_v2, %v1621_v32  ;;  %v410_v5 = vpack.c.bf16 %v1435_v2, %v1435_v2 }
 0x44f   :  { %1310 = vmatmul.mubr.msk.bf16.vlgmr.msra.gmra.mxu0 %vm127_vm2, %v410_v5  ;;  %v408_v8 = vsel %vm403_vm7, %v407_v4, %v355_v58 }
 0x450   :  { %1322 = vmatpush3.bf16.msra.mxu0 %v1576_v3  ;;  %1325 = vmatprep.mubr.msk.bf16.mxu0 %vm1511_vm0, %v1510_v1 }
 0x451   :  { %1323 = vmatprep.subr.bf16.mxu0 %v1510_v1 }
 0x454   :  { %1324 = vmatpush3.bf16.msra.mxu0 %v1585_v6 }
 0x455   :  { %1337 = vmatprep.subr.bf16.mxu0 %v1510_v1 }
 0x50f   :  { %v448_v10 = vpop.f32.mrf.mxu0 }
 0x510   :  { %v454_v11 = vadd.f32 %v448_v10, %v409_v9 }
 0x511   :  { %v1311_v12 = vpop.f32.mrf.mxu0 }
 0x512   :  { %1436 = vtanh.f32 %v454_v11 }
 0x513   :  { %v451_v13 = vpop.f32.mrf.mxu0 }
 0x515   :  { %v1312_v14 = vpop.f32.mrf.mxu0 }
 0x51f   :  { %v1437_v15 = vpop.eup %1436 }
 0x520   :  { %v460_v3 = vrot.slane %v1437_v15, %v1621_v32  ;;  %v463_v16 = vpack.c.bf16 %v1437_v15, %v1437_v15 }
 0x522   :  { %1318 = vmatmul.mubr.msk.bf16.vlgmr.msra.gmra.mxu1 %vm127_vm2, %v463_v16  ;;  %v461_v6 = vsel %vm456_vm8, %v460_v3, %v408_v8 }
 0x523   :  { %1333 = vmatprep.mubr.msk.bf16.mxu1 %vm1511_vm0, %v1510_v1  ;;  %1330 = vmatpush3.bf16.msra.mxu1 %v1422_v27 }
 0x524   :  { %1331 = vmatprep.subr.bf16.mxu1 %v1510_v1 }
 0x527   :  { %1332 = vmatpush3.bf16.msra.mxu1 %v1423_v28 }
 0x528   :  { %1345 = vmatprep.subr.bf16.mxu1 %v1510_v1 }
 0x5e2   :  { %v501_v18 = vpop.f32.mrf.mxu1 }
 0x5e3   :  { %v507_v19 = vadd.f32 %v501_v18, %v462_v17 }
 0x5e4   :  { %v1319_v20 = vpop.f32.mrf.mxu1 }
 0x5e5   :  { %1438 = vtanh.f32 %v507_v19 }
 0x5e6   :  { %v504_v21 = vpop.f32.mrf.mxu1 }
 0x5e8   :  { %v1320_v22 = vpop.f32.mrf.mxu1 }
 0x5f2   :  { %v1439_v23 = vpop.eup %1438 }
 0x5f3   :  { %v513_v24 = vrot.slane %v1439_v23, %v1621_v32  ;;  %v516_v25 = vpack.c.bf16 %v1439_v23, %v1439_v23 }
 0x5f5   :  { %1326 = vmatmul.mubr.msk.bf16.vlgmr.msra.gmra.mxu0 %vm127_vm2, %v516_v25  ;;  %v514_v26 = vsel %vm509_vm9, %v513_v24, %v461_v6 }
 0x5f6   :  { %1341 = vmatprep.mubr.msk.bf16.mxu0 %vm1511_vm0, %v1510_v1  ;;  %1338 = vmatpush3.bf16.msra.mxu0 %v1688_v29 }
 0x5f7   :  { %1339 = vmatprep.subr.bf16.mxu0 %v1510_v1 }
 0x5fa   :  { %1340 = vmatpush3.bf16.msra.mxu0 %v1696_v31 }
 0x5fb   :  { %1353 = vmatprep.subr.bf16.mxu0 %v1510_v1 }
 0x5fd   :  { %1342 = vmatmul.mubr.bf16.vlgmr.msra.gmra.mxu0 %v1512_v7 }
 0x5fe   :  { %1354 = vmatpush3.bf16.msra.mxu0 %v1688_v29  ;;  %1357 = vmatprep.mubr.msk.bf16.mxu0 %vm1511_vm0, %v1510_v1 }
 0x5ff   :  { %1355 = vmatprep.subr.bf16.mxu0 %v1510_v1 }
 0x602   :  { %1356 = vmatpush3.bf16.msra.mxu0 %v1696_v31 }
 0x603   :  { %1369 = vmatprep.subr.bf16.mxu0 %v1510_v1 }
 0x6b5   :  { %v554_v34 = vpop.f32.mrf.mxu0 }
 0x6b6   :  { %v560_v35 = vadd.f32 %v554_v34, %v515_v33 }
 0x6b7   :  { %v1327_v36 = vpop.f32.mrf.mxu0 }
 0x6b8   :  { %1440 = vtanh.f32 %v560_v35 }
 0x6b9   :  { %v557_v37 = vpop.f32.mrf.mxu0 }
 0x6bb   :  { %v1328_v38 = vpop.f32.mrf.mxu0 }
 0x6bd   :  { %v692_v42 = vpop.f32.mrf.mxu0 }
 0x6bf   :  { %v1343_v43 = vpop.f32.mrf.mxu0 }
 0x6c1   :  { %v695_v44 = vpop.f32.mrf.mxu0 }
 0x6c3   :  { %v1344_v45 = vpop.f32.mrf.mxu0 }
 0x6c5   :  { %v1441_v39 = vpop.eup %1440 }
 0x6c6   :  { %v566_v7 = vrot.slane %v1441_v39, %v1621_v32 }
 0x6c8   :  { %v567_v40 = vsel %vm562_vm10, %v566_v7, %v514_v26 }
 0x6c9   :  { %v568_v41 = vpack.c.bf16 %v567_v40, %v567_v40 }
 0x6cb   :  { %1334 = vmatmul.mubr.msk.bf16.vlgmr.msra.gmra.mxu1 %vm127_vm2, %v568_v41 }
 0x6cc   :  { %1346 = vmatpush3.bf16.msra.mxu1 %v1688_v29  ;;  %1349 = vmatprep.mubr.msk.bf16.mxu1 %vm1511_vm0, %v1510_v1 }
 0x6cd   :  { %1347 = vmatprep.subr.bf16.mxu1 %v1510_v1 }
 0x6d0   :  { %1348 = vmatpush3.bf16.msra.mxu1 %v1696_v31 }
 0x6d1   :  { %1361 = vmatprep.subr.bf16.mxu1 %v1510_v1 }
 0x78b   :  { %v627_v47 = vpop.f32.mrf.mxu1 }
 0x78c   :  { %v628_v49 = vadd.f32 %v1180_v46, %v627_v47 }
 0x78d   :  { %v1335_v50 = vpop.f32.mrf.mxu1 }
 0x78e   :  { %v638_v51 = vadd.f32 %v1184_v48, %v628_v49 }
 0x78f   :  { %v630_v52 = vpop.f32.mrf.mxu1 }
 0x790   :  { %639 = vst.msk [vmem:[#allocation2] sm:$0xff] %vm127_vm2, %v638_v51 }
 0x791   :  { %v1336_v53 = vpop.f32.mrf.mxu1 }
 0x797   :  { %v645_v54 = vld [vmem:[#allocation2] sm:$0x1]  ;;  %v705_v58 = vld [vmem:[#allocation2 + $0x1] sm:$0x1]  ;;  %v757_v10 = vld [vmem:[#allocation2 + $0x2] sm:$0x1] }
 0x798   :  { %v698_v55 = vadd.f32 %v692_v42, %v645_v54  ;;  %v809_v18 = vld [vmem:[#allocation2 + $0x3] sm:$0x1]  ;;  %v861_v28 = vld [vmem:[#allocation2 + $0x4] sm:$0x1]  ;;  %v913_v41 = vld [vmem:[#allocation2 + $0x5] sm:$0x1] }
 0x79a   :  { %1442 = vtanh.f32 %v698_v55 }
 0x7a7   :  { %v1443_v56 = vpop.eup %1442 }
 0x7a8   :  { %v706_v57 = vpack.c.bf16 %v1443_v56, %v1443_v56  ;;  %v703_v0 = vrot.slane %v1443_v56, %v1621_v32 }
 0x7aa   :  { %1350 = vmatmul.mubr.msk.bf16.vlgmr.msra.gmra.mxu1 %vm127_vm2, %v706_v57  ;;  %v704_v8 = vsel %vm191_vm3, %v703_v0, 0.0 }
 0x7ab   :  { %1362 = vmatpush3.bf16.msra.mxu1 %v1688_v29  ;;  %1365 = vmatprep.mubr.msk.bf16.mxu1 %vm1511_vm0, %v1510_v1 }
 0x7ac   :  { %1363 = vmatprep.subr.bf16.mxu1 %v1510_v1 }
 0x7af   :  { %1364 = vmatpush3.bf16.msra.mxu1 %v1696_v31 }
 0x7b0   :  { %1377 = vmatprep.subr.bf16.mxu1 %v1510_v1 }
 0x86a   :  { %v744_v59 = vpop.f32.mrf.mxu1 }
 0x86b   :  { %v750_v60 = vadd.f32 %v744_v59, %v705_v58  ;;  %v1072_v59 = vld [vmem:[%s1813_s6 + $0x18] sm:$0xff] }
 0x86c   :  { %v1351_v61 = vpop.f32.mrf.mxu1 }
 0x86d   :  { %1444 = vtanh.f32 %v750_v60  ;;  %v1071_v60 = vld [vmem:[%s1813_s6 + $0x10] sm:$0xff]  ;;  %v1070_v61 = vld [vmem:[%s1813_s6 + $0x8] sm:$0xff] }
 0x86e   :  { %v747_v62 = vpop.f32.mrf.mxu1 }
 0x86f   :  { %v1069_v62 = vld [vmem:[%s1813_s6] sm:$0xff] }
 0x870   :  { %v1352_v63 = vpop.f32.mrf.mxu1 }
 0x871   :  { %v1017_v63 = vld [vmem:[#allocation2 + $0x7] sm:$0x1] }
 0x87a   :  { %v1445_v2 = vpop.eup %1444 }
 0x87b   :  { %v755_v4 = vrot.slane %v1445_v2, %v1621_v32  ;;  %v758_v5 = vpack.c.bf16 %v1445_v2, %v1445_v2 }
 0x87d   :  { %1358 = vmatmul.mubr.msk.bf16.vlgmr.msra.gmra.mxu0 %vm127_vm2, %v758_v5  ;;  %v756_v9 = vsel %vm244_vm4, %v755_v4, %v704_v8 }
 0x87e   :  { %1370 = vmatpush3.bf16.msra.mxu0 %v1688_v29  ;;  %1373 = vmatprep.mubr.msk.bf16.mxu0 %vm1511_vm0, %v1510_v1 }
 0x87f   :  { %1371 = vmatprep.subr.bf16.mxu0 %v1510_v1 }
 0x882   :  { %1372 = vmatpush3.bf16.msra.mxu0 %v1696_v31 }
 0x883   :  { %1385 = vmatprep.subr.bf16.mxu0 %v1510_v1 }
 0x93d   :  { %v796_v11 = vpop.f32.mrf.mxu0 }
 0x93e   :  { %v802_v12 = vadd.f32 %v796_v11, %v757_v10 }
 0x93f   :  { %v1359_v13 = vpop.f32.mrf.mxu0 }
 0x940   :  { %1446 = vtanh.f32 %v802_v12  ;;  %v1198_v12 = vld [vmem:[#allocation3] ss:$0 sm:$0xff] }
 0x941   :  { %v799_v14 = vpop.f32.mrf.mxu0 }
 0x943   :  { %v1360_v15 = vpop.f32.mrf.mxu0 }
 0x94d   :  { %v1447_v3 = vpop.eup %1446 }
 0x94e   :  { %v807_v16 = vrot.slane %v1447_v3, %v1621_v32  ;;  %v810_v6 = vpack.c.bf16 %v1447_v3, %v1447_v3 }
 0x950   :  { %1366 = vmatmul.mubr.msk.bf16.vlgmr.msra.gmra.mxu1 %vm127_vm2, %v810_v6  ;;  %v808_v17 = vsel %vm297_vm5, %v807_v16, %v756_v9 }
 0x951   :  { %1378 = vmatpush3.bf16.msra.mxu1 %v1688_v29  ;;  %1381 = vmatprep.mubr.msk.bf16.mxu1 %vm1511_vm0, %v1510_v1 }
 0x952   :  { %1379 = vmatprep.subr.bf16.mxu1 %v1510_v1 }
 0x955   :  { %1380 = vmatpush3.bf16.msra.mxu1 %v1696_v31 }
 0x956   :  { %1393 = vmatprep.subr.bf16.mxu1 %v1510_v1 }
 0xa10   :  { %v848_v19 = vpop.f32.mrf.mxu1 }
 0xa11   :  { %v854_v20 = vadd.f32 %v848_v19, %v809_v18 }
 0xa12   :  { %v1367_v21 = vpop.f32.mrf.mxu1 }
 0xa13   :  { %1448 = vtanh.f32 %v854_v20 }
 0xa14   :  { %v851_v22 = vpop.f32.mrf.mxu1 }
 0xa16   :  { %v1368_v23 = vpop.f32.mrf.mxu1 }
 0xa20   :  { %v1449_v24 = vpop.eup %1448 }
 0xa21   :  { %v859_v25 = vrot.slane %v1449_v24, %v1621_v32  ;;  %v862_v26 = vpack.c.bf16 %v1449_v24, %v1449_v24 }
 0xa23   :  { %1374 = vmatmul.mubr.msk.bf16.vlgmr.msra.gmra.mxu0 %vm127_vm2, %v862_v26  ;;  %v860_v27 = vsel %vm350_vm6, %v859_v25, %v808_v17 }
 0xa24   :  { %1386 = vmatpush3.bf16.msra.mxu0 %v1688_v29  ;;  %1389 = vmatprep.mubr.msk.bf16.mxu0 %vm1511_vm0, %v1510_v1 }
 0xa25   :  { %1387 = vmatprep.subr.bf16.mxu0 %v1510_v1 }
 0xa28   :  { %1388 = vmatpush3.bf16.msra.mxu0 %v1696_v31 }
 0xa29   :  { %1401 = vmatprep.subr.mxu0 %v1510_v1 }
 0xae3   :  { %v900_v33 = vpop.f32.mrf.mxu0 }
 0xae4   :  { %v906_v34 = vadd.f32 %v900_v33, %v861_v28 }
 0xae5   :  { %v1375_v35 = vpop.f32.mrf.mxu0 }
 0xae6   :  { %1450 = vtanh.f32 %v906_v34 }
 0xae7   :  { %v903_v36 = vpop.f32.mrf.mxu0 }
 0xae9   :  { %v1376_v37 = vpop.f32.mrf.mxu0 }
 0xaf3   :  { %v1451_v38 = vpop.eup %1450 }
 0xaf4   :  { %v911_v39 = vrot.slane %v1451_v38, %v1621_v32  ;;  %v914_v7 = vpack.c.bf16 %v1451_v38, %v1451_v38 }
 0xaf6   :  { %1382 = vmatmul.mubr.msk.bf16.vlgmr.msra.gmra.mxu1 %vm127_vm2, %v914_v7  ;;  %v912_v40 = vsel %vm403_vm7, %v911_v39, %v860_v27 }
 0xaf7   :  { %1394 = vmatpush3.bf16.msra.mxu1 %v1688_v29  ;;  %1397 = vmatprep.mubr.msk.bf16.mxu1 %vm1511_vm0, %v1510_v1 }
 0xaf8   :  { %1395 = vmatprep.subr.bf16.mxu1 %v1510_v1 }
 0xafb   :  { %1396 = vmatpush3.bf16.msra.mxu1 %v1696_v31  ;;  %v965_v31 = vld [vmem:[#allocation2 + $0x6] sm:$0x1] }
 0xbb6   :  { %v952_v42 = vpop.f32.mrf.mxu1 }
 0xbb7   :  { %v958_v43 = vadd.f32 %v952_v42, %v913_v41 }
 0xbb8   :  { %v1383_v44 = vpop.f32.mrf.mxu1 }
 0xbb9   :  { %1452 = vtanh.f32 %v958_v43 }
 0xbba   :  { %v955_v45 = vpop.f32.mrf.mxu1 }
 0xbbc   :  { %v1384_v46 = vpop.f32.mrf.mxu1 }
 0xbc6   :  { %v1453_v47 = vpop.eup %1452 }
 0xbc7   :  { %v966_v48 = vpack.c.bf16 %v1453_v47, %v1453_v47  ;;  %v963_v49 = vrot.slane %v1453_v47, %v1621_v32 }
 0xbc9   :  { %1390 = vmatmul.mubr.msk.bf16.vlgmr.msra.gmra.mxu0 %vm127_vm2, %v966_v48  ;;  %v964_v29 = vsel %vm456_vm8, %v963_v49, %v912_v40 }
 0xbca   :  { %1409 = vmatprep.mubr.msk.f32.mxu0 %vm1511_vm0, %v1510_v1  ;;  %1402 = vmatpush3.msra.mxu0 %v1072_v59 }
 0xbcb   :  { %1403 = vmatprep.subr.mxu0 %v1510_v1 }
 0xbcc   :  { %1404 = vmatpush3.msra.mxu0 %v1071_v60 }
 0xbcd   :  { %1405 = vmatprep.subr.mxu0 %v1510_v1 }
 0xbce   :  { %1406 = vmatpush3.msra.mxu0 %v1070_v61 }
 0xbcf   :  { %1407 = vmatprep.subr.mxu0 %v1510_v1 }
 0xbd0   :  { %1408 = vmatpush3.msra.mxu0 %v1069_v62 }
 0xc89   :  { %v1004_v50 = vpop.f32.mrf.mxu0 }
 0xc8a   :  { %v1010_v51 = vadd.f32 %v1004_v50, %v965_v31 }
 0xc8b   :  { %v1391_v52 = vpop.f32.mrf.mxu0 }
 0xc8c   :  { %1454 = vtanh.f32 %v1010_v51 }
 0xc8d   :  { %v1007_v53 = vpop.f32.mrf.mxu0 }
 0xc8f   :  { %v1392_v54 = vpop.f32.mrf.mxu0 }
 0xc99   :  { %v1455_v55 = vpop.eup %1454 }
 0xc9a   :  { %v1018_v56 = vpack.c.bf16 %v1455_v55, %v1455_v55  ;;  %v1015_v57 = vrot.slane %v1455_v55, %v1621_v32 }
 0xc9c   :  { %1398 = vmatmul.mubr.msk.bf16.vlgmr.msra.gmra.mxu1 %vm127_vm2, %v1018_v56  ;;  %v1016_v58 = vsel %vm509_vm9, %v1015_v57, %v964_v29 }
 0xd5c   :  { %v1056_v0 = vpop.f32.mrf.mxu1 }
 0xd5d   :  { %v1062_v2 = vadd.f32 %v1056_v0, %v1017_v63 }
 0xd5e   :  { %v1399_v4 = vpop.f32.mrf.mxu1 }
 0xd5f   :  { %1456 = vtanh.f32 %v1062_v2 }
 0xd60   :  { %v1059_v5 = vpop.f32.mrf.mxu1 }
 0xd62   :  { %v1400_v8 = vpop.f32.mrf.mxu1 }
 0xd6c   :  { %v1457_v9 = vpop.eup %1456 }
 0xd6d   :  { %v1067_v10 = vrot.slane %v1457_v9, %v1621_v32 }
 0xd6f   :  { %v1068_v11 = vsel %vm562_vm10, %v1067_v10, %v1016_v58 }
 0xd70   :  { %1410 = vmatmul.mubr.msk.f32.vlgmr.msra.gmra.mxu0 %vm127_vm2, %v1068_v11 }
 0xe30   :  { %v1149_v13 = vpop.f32.mrf.mxu0 }
 0xe31   :  { %v1150_v14 = vadd.f32 %v1198_v12, %v1149_v13 }
 0xe32   :  { %v1411_v1 = vpop.f32.mrf.mxu0 }
 0xe33   :  { %v1200_v15 = vmul.f32 -1.442695, %v1150_v14 }
 0xe35   :  { %1458 = vpow2.f32 %v1200_v15 }
 0xe42   :  { %v1459_v3 = vpop.eup %1458 }
 0xe43   :  { %v1156_v16 = vadd.f32 1.0, %v1459_v3 }
 0xe45   :  { %1460 = vrcp.f32 %v1156_v16 }
 0xe52   :  { %v1461_v6 = vpop.eup %1460 }
 0xe53   :  { %1160 = vst.msk [vmem:[%s1815_s8] sm:$0xff] %vm1159_vm11, %v1461_v6 }
 0xe54   :  { %1165 = vsyncpa [#allocation5], 1 }
 0xe55   :  { %1166 = vsyncpa [#allocation7], 1 }

</bundles_post_ra>
